<compile_context>
chip_gen: v7x
topology: tpu7x:2x2x1
jax: 0.10.0
libtpu: 0.0.40
codegen_flags: <defaults>
</compile_context>

<pallas_src>
import jax
import jax.numpy as jnp
from jax.experimental import pallas as pl
from jax.experimental.pallas import tpu as pltpu


def _undo_gap_kernel(f_ref, o_ref):
    # f_ref: (TM, 1) scalars, o_ref: (TM, HW).
    # Pure lane-broadcast (one VPU splat per output vreg); the kernel is
    # HBM-write bound, so all that matters is keeping the output DMA streaming.
    o_ref[...] = jnp.broadcast_to(f_ref[...], o_ref.shape)


def undo_global_avg_pool(features, sizes_list, *, target_tile_bytes=2 * 1024 * 1024):
    """features: (B, C) array. sizes_list: python list of size tuples; pops last.

    Returns features broadcast to (B, C, *sizes[2:]), matching the PyTorch module.
    """
    # Mirrors the PyTorch module's stateful .pop(); this happens at trace time.
    sizes = sizes_list.pop()

    B, C = int(features.shape[0]), int(features.shape[1])
    spatial = tuple(int(s) for s in sizes[2:])
    hw = 1
    for s in spatial:
        hw *= s

    rows = B * C
    itemsize = jnp.dtype(features.dtype).itemsize
    # dtype-aware sublane multiple: f32 -> 8, bf16 -> 16, int8/fp8 -> 32.
    sublane = max(8, 32 // itemsize)

    # Row-tile size: largest multiple of `sublane` whose output tile is about
    # `target_tile_bytes` (1-8 MiB sweet spot). Double-buffered, this stays
    # comfortably inside the scoped-VMEM budget of every TPU generation.
    row_bytes = max(1, hw * itemsize)
    tm = (target_tile_bytes // row_bytes) // sublane * sublane
    tm = max(sublane, tm)
    if tm >= rows:
        tm = rows  # one block covering the full row axis (always legal)
    grid_rows = pl.cdiv(rows, tm)

    f2d = features.reshape(rows, 1)

    # TODO(synk): when hw % 128 != 0 (e.g. 7x7 / 14x14 feature maps) the output
    # stores are lane-masked; a grouped (rows/k, k*hw) lane-dense output view
    # would need an in-kernel repeat across lanes and is not implemented here.
    out2d = pl.pallas_call(
        _undo_gap_kernel,
        out_shape=jax.ShapeDtypeStruct((rows, hw), features.dtype),
        grid=(grid_rows,),
        in_specs=[pl.BlockSpec((tm, 1), lambda i: (i, 0))],
        out_specs=pl.BlockSpec((tm, hw), lambda i: (i, 0)),
        compiler_params=pltpu.CompilerParams(
            # Independent row tiles: shard grid steps across both v7x
            # TensorCores; harmless no-op on single-TC v5e/v6e.
            dimension_semantics=("parallel",),
            # Per-step footprint is ~2x(out tile) + 2x(in tile) << 32 MiB,
            # which fits every generation (v7x physical VMEM = 64 MiB/TC).
            vmem_limit_bytes=32 * 1024 * 1024,
        ),
    )(f2d)

    # The flat memory order already matches NCHW, so this reshape is free.
    return out2d.reshape(B, C, *spatial)


if __name__ == "__main__":
    key = jax.random.PRNGKey(0)

    # --- main test: shape implied by the module (batch=2, channels=4, 16x16) ---
    B, C, H, W = 2, 4, 16, 16
    features = jax.random.normal(key, (B, C), dtype=jnp.float32)
    sizes_list = [(B, C, H, W)]

    out = undo_global_avg_pool(features, sizes_list)
    out = jax.block_until_ready(out)

    ref = jnp.broadcast_to(features[:, :, None, None], (B, C, H, W))
    assert out.shape == (B, C, H, W), out.shape
    assert out.dtype == features.dtype
    assert jnp.allclose(out, ref), "mismatch vs reference broadcast"

    # --- second small test: force a multi-step row grid (tiled path) ---
    B2, C2, H2, W2 = 2, 64, 8, 8  # rows = 128, hw = 64
    feats2 = jax.random.normal(jax.random.PRNGKey(1), (B2, C2), dtype=jnp.float32)
    out2 = undo_global_avg_pool(
        feats2, [(B2, C2, H2, W2)], target_tile_bytes=16 * 1024  # -> TM=64, grid=(2,)
    )
    out2 = jax.block_until_ready(out2)
    ref2 = jnp.broadcast_to(feats2[:, :, None, None], (B2, C2, H2, W2))
    assert out2.shape == (B2, C2, H2, W2)
    assert jnp.allclose(out2, ref2), "mismatch vs reference broadcast (tiled path)"

    print("KERNEL_OK")
</pallas_src>

<mosaic_0001>
module attributes {stable_mosaic.version = 11 : i64} {
  func.func @_undo_gap_kernel(%arg0: i32, %arg1: memref<8x1xf32, #tpu.memory_space<vmem>>, %arg2: memref<8x256xf32, #tpu.memory_space<vmem>>) attributes {dimension_semantics = [#tpu.dimension_semantics<parallel>], iteration_bounds = array<i64: 1>, scalar_prefetch = 0 : i64, scratch_operands = 0 : i64, tpu.core_type = #tpu.core_type<tc>, window_params = [{transform_indices = @transform_0, window_bounds = array<i64: 8, 1>}, {transform_indices = @transform_1, window_bounds = array<i64: 8, 256>}]} {
    %c0 = arith.constant 0 : index
    %c0_0 = arith.constant 0 : index
    %0 = vector.load %arg1[%c0, %c0_0] : memref<8x1xf32, #tpu.memory_space<vmem>>, vector<8x1xf32>
    %1 = vector.shape_cast %0 : vector<8x1xf32> to vector<8x1xf32>
    %2 = vector.broadcast %1 : vector<8x1xf32> to vector<8x256xf32>
    %c0_1 = arith.constant 0 : index
    %c0_2 = arith.constant 0 : index
    %3 = vector.load %arg2[%c0_1, %c0_2] : memref<8x256xf32, #tpu.memory_space<vmem>>, vector<8x256xf32>
    tpu.vector_store %arg2[%c0_1, %c0_2], %2 {strides = array<i32>} : memref<8x256xf32, #tpu.memory_space<vmem>>, vector<8x256xf32>,
    return
  }
  func.func @transform_0(%arg0: i32) -> (i32, i32) {
    %c0_i32 = arith.constant 0 : i32
    %c0_i32_0 = arith.constant 0 : i32
    return %arg0, %c0_i32 : i32, i32
  }
  func.func @transform_1(%arg0: i32) -> (i32, i32) {
    %c0_i32 = arith.constant 0 : i32
    %c0_i32_0 = arith.constant 0 : i32
    return %arg0, %c0_i32 : i32, i32
  }
}

</mosaic_0001>

<bundles_post_ra>
// kernel: tpu_custom_call.1
= control target key start
LH: loop header
LB: loop body
LE: loop exit
PB: predicated region body
PF: predicated region fallthrough
CT: control target
= control target key end

     0   :  { %s85_s0 = inlined_call_operand.vmem [shape: f32[8,1], index: 0, kind: input, shape index: {}]   ;;  %s86_s1 = inlined_call_operand.hbm [shape: f32[8,256], index: 1, kind: output, shape index: {}]  }
   0x1   :  { %v9_v0 = vld [vmem:[%s85_s0] sm:$0xff] }
   0x2   :  { %6 = vsyncpa [#allocation3], 0  ;;  %v58_v1 = vmov 0   ;;  %s59_s8 = smov [#allocation2]  }
   0x3   :  { %33 = vset.pattern.permute.xlu0 %v58_v1  ;;  %s23_s9 = sshll.u32 %s59_s8, 4  ;;  %s24_s9 = int_to_ptr.vmem [resolvable:$true] %s23_s9 }
   0x4   :  { %12 = vperm.xlu0 %33, %v9_v0   ;;  %s34_s10 = scalar_lea.vmem %s24_s9, 256  ;;  %p39_p1 = scmp.lt.s32.totalorder %s24_s9, %s24_s9 }
   0x5   :  { %p35_p0 = scmp.ne.s32.totalorder %s24_s9, %s34_s10  ;;  %p40_p2 = scmp.lt.s32.totalorder %s34_s10, %s34_s10 }
   0x7   :  { %p41_p3 = por %p40_p2, %p39_p1 }
   0x9   :  { %p42_p4 = pnand %p41_p3, %p35_p0 }
  0x83   :  { %v13_v2 = vpop.permute.xlu0 %12 }
  0x84   :  { %15 = vst [vmem:[#allocation2] sm:$0xff] %v13_v2  ;;  %16 = vst [vmem:[#allocation2 + $0x8] sm:$0xff] %v13_v2 }
  0x85   :  { %45 = shalt.err (!%p42_p4)
}
  0x86   :  { %s46_s0 = scalar_lea.hbm %s86_s1, 256 }
  0x87   :  { %p47_p5 = scmp.ne.s32.totalorder %s86_s1, %s46_s0  ;;  %p50_p6 = scmp.lt.u32.totalorder %s46_s0, %s86_s1 }
  0x89   :  { %p52_p7 = pnand %p50_p6, %p47_p5 }
  0x8b   :  { %55 = shalt.err (!%p52_p7)
}
  0x8c   :  { %26 = dma.vmem_to_hbm [thread:$0]  %s24_s9, 256, %s86_s1, [#allocation3]  }
  0x8d   :  { %56 = dma.done.wait [#allocation3], 256  }
  0x8e   :  { %57 = vsyncadd [#allocation3], 4294967040 }
  0x8f   :  { %30 = vsyncpa [#allocation3], 1 }

</bundles_post_ra>
